<compile_context>
chip_gen: v6e
topology: v6e:2x2x1
jax: 0.10.0
libtpu: 0.0.40
codegen_flags: <defaults>
</compile_context>

<pallas_src>
import jax
import jax.numpy as jnp
from jax.experimental import pallas as pl
from jax.experimental.pallas import tpu as pltpu

SPACE_SIZE = 2     # env.observation_space.shape[0] for MountainCarContinuous-v0
HIDDEN = 4
ACTION_SPACE = 1   # env.action_space.shape[0]

LANE = 128         # TPU lane width
MAX_TB = 1024      # batch tile cap (keeps tiles ~KBs; safe on v7x 64 MiB VMEM)

# Packed-parameter layout (row-major, weights stored (in_features, out_features))
W1_OFF = 0
B1_OFF = W1_OFF + SPACE_SIZE * HIDDEN
W2_OFF = B1_OFF + HIDDEN
B2_OFF = W2_OFF + HIDDEN * ACTION_SPACE
N_PARAMS = B2_OFF + ACTION_SPACE          # = 17


def _round_up(x, m):
    return ((x + m - 1) // m) * m


def _actor_kernel(p_ref, x_ref, o_ref):
    """p_ref: (N_PARAMS,) f32 in SMEM.
    x_ref: (SPACE_SIZE, TB) f32 in VMEM (batch on lanes).
    o_ref: (ACTION_SPACE, TB) f32 in VMEM.
    """
    x = x_ref[...]                                    # (SPACE_SIZE, TB)

    # fc1 + ReLU : h_j = relu(sum_i x[i,:] * w1[i,j] + b1[j])   -> (1, TB) each
    hidden = []
    for j in range(HIDDEN):
        h = x[0:1, :] * p_ref[W1_OFF + 0 * HIDDEN + j]
        for i in range(1, SPACE_SIZE):
            h = h + x[i:i + 1, :] * p_ref[W1_OFF + i * HIDDEN + j]
        h = h + p_ref[B1_OFF + j]
        hidden.append(jnp.maximum(h, 0.0))

    # fc2 + Tanh : y_k = tanh(sum_j h_j * w2[j,k] + b2[k])      -> (1, TB)
    for k in range(ACTION_SPACE):
        y = hidden[0] * p_ref[W2_OFF + 0 * ACTION_SPACE + k]
        for j in range(1, HIDDEN):
            y = y + hidden[j] * p_ref[W2_OFF + j * ACTION_SPACE + k]
        y = y + p_ref[B2_OFF + k]
        o_ref[k:k + 1, :] = jnp.tanh(y)


def pack_params(w1, b1, w2, b2):
    """w1: (SPACE_SIZE, HIDDEN), b1: (HIDDEN,), w2: (HIDDEN, ACTION_SPACE), b2: (ACTION_SPACE,)."""
    return jnp.concatenate([
        w1.reshape(-1), b1.reshape(-1), w2.reshape(-1), b2.reshape(-1)
    ]).astype(jnp.float32)


def actor_forward(states, params_packed):
    """states: (B, SPACE_SIZE) f32. params_packed: (N_PARAMS,) f32.
    Returns (B, ACTION_SPACE) f32."""
    B = states.shape[0]

    # Wrapper-side layout plumbing: batch -> lanes, pad batch to the tile size.
    x_t = jnp.asarray(states, jnp.float32).T          # (SPACE_SIZE, B)
    tb = min(_round_up(B, LANE), MAX_TB)              # lane-aligned batch tile
    b_pad = _round_up(B, tb)
    if b_pad != B:
        x_t = jnp.pad(x_t, ((0, 0), (0, b_pad - B)))

    out_t = pl.pallas_call(
        _actor_kernel,
        out_shape=jax.ShapeDtypeStruct((ACTION_SPACE, b_pad), jnp.float32),
        grid=(b_pad // tb,),
        in_specs=[
            # 17 packed scalars live in SMEM; feed the VPU broadcasts directly.
            pl.BlockSpec(memory_space=pltpu.MemorySpace.SMEM),
            # Batch-tiled states: feature dim full-extent, batch on lanes.
            pl.BlockSpec((SPACE_SIZE, tb), lambda i: (0, i)),
        ],
        out_specs=pl.BlockSpec((ACTION_SPACE, tb), lambda i: (0, i)),
        compiler_params=pltpu.CompilerParams(
            dimension_semantics=("parallel",),        # shard batch across TCs (v7x)
        ),
    )(params_packed, x_t)

    return out_t.T[:B]                                # (B, ACTION_SPACE)


def init_params(key):
    """Deterministic init matching nn.Linear shapes (stored transposed)."""
    k1, k2, k3, k4 = jax.random.split(key, 4)
    lim1 = 1.0 / (SPACE_SIZE ** 0.5)
    lim2 = 1.0 / (HIDDEN ** 0.5)
    w1 = jax.random.uniform(k1, (SPACE_SIZE, HIDDEN), jnp.float32, -lim1, lim1)
    b1 = jax.random.uniform(k2, (HIDDEN,), jnp.float32, -lim1, lim1)
    w2 = jax.random.uniform(k3, (HIDDEN, ACTION_SPACE), jnp.float32, -lim2, lim2)
    b2 = jax.random.uniform(k4, (ACTION_SPACE,), jnp.float32, -lim2, lim2)
    return w1, b1, w2, b2


def actor_ref(states, w1, b1, w2, b2):
    h = jnp.maximum(states @ w1 + b1[None, :], 0.0)
    return jnp.tanh(h @ w2 + b2[None, :])


if __name__ == "__main__":
    key = jax.random.PRNGKey(0)
    kx, kx2, kp = jax.random.split(key, 3)

    w1, b1, w2, b2 = init_params(kp)
    params = pack_params(w1, b1, w2, b2)

    # Small batch (typical single env step style call).
    B = 8
    states = jax.random.normal(kx, (B, SPACE_SIZE), jnp.float32)
    out = jax.block_until_ready(actor_forward(states, params))
    expected = actor_ref(states, w1, b1, w2, b2)
    assert out.shape == (B, ACTION_SPACE)
    assert jnp.allclose(out, expected, atol=1e-5, rtol=1e-5), "mismatch vs reference (B=8)"

    # Non-multiple-of-128 batch to exercise the padding / lane-masking path.
    B2 = 200
    states2 = jax.random.normal(kx2, (B2, SPACE_SIZE), jnp.float32)
    out2 = jax.block_until_ready(actor_forward(states2, params))
    expected2 = actor_ref(states2, w1, b1, w2, b2)
    assert out2.shape == (B2, ACTION_SPACE)
    assert jnp.allclose(out2, expected2, atol=1e-5, rtol=1e-5), "mismatch vs reference (B=200)"

    print("KERNEL_OK")
</pallas_src>

<mosaic_0001>
module attributes {stable_mosaic.version = 11 : i64} {
  func.func @_actor_kernel(%arg0: i32, %arg1: memref<17xf32, #tpu.memory_space<smem>>, %arg2: memref<2x128xf32, #tpu.memory_space<vmem>>, %arg3: memref<1x128xf32, #tpu.memory_space<vmem>>) attributes {dimension_semantics = [#tpu.dimension_semantics<parallel>], iteration_bounds = array<i64: 1>, scalar_prefetch = 0 : i64, scratch_operands = 0 : i64, tpu.core_type = #tpu.core_type<tc>, window_params = [{transform_indices = @transform_0, window_bounds = array<i64: 17>}, {transform_indices = @transform_1, window_bounds = array<i64: 2, 128>}, {transform_indices = @transform_2, window_bounds = array<i64: 1, 128>}]} {
    %c0 = arith.constant 0 : index
    %c0_0 = arith.constant 0 : index
    %0 = vector.load %arg2[%c0, %c0_0] : memref<2x128xf32, #tpu.memory_space<vmem>>, vector<2x128xf32>
    %1 = vector.extract_strided_slice %0 {offsets = [0, 0], sizes = [1, 128], strides = [1, 1]} : vector<2x128xf32> to vector<1x128xf32>
    %c0_1 = arith.constant 0 : index
    %2 = memref.load %arg1[%c0_1] : memref<17xf32, #tpu.memory_space<smem>>
    %3 = vector.broadcast %2 : f32 to vector<1x128xf32>
    %4 = arith.mulf %1, %3 : vector<1x128xf32>
    %5 = vector.extract_strided_slice %0 {offsets = [1, 0], sizes = [1, 128], strides = [1, 1]} : vector<2x128xf32> to vector<1x128xf32>
    %c4 = arith.constant 4 : index
    %6 = memref.load %arg1[%c4] : memref<17xf32, #tpu.memory_space<smem>>
    %7 = vector.broadcast %6 : f32 to vector<1x128xf32>
    %8 = arith.mulf %5, %7 : vector<1x128xf32>
    %9 = arith.addf %4, %8 : vector<1x128xf32>
    %c8 = arith.constant 8 : index
    %10 = memref.load %arg1[%c8] : memref<17xf32, #tpu.memory_space<smem>>
    %11 = vector.broadcast %10 : f32 to vector<1x128xf32>
    %12 = arith.addf %9, %11 : vector<1x128xf32>
    %cst = arith.constant 0.000000e+00 : f32
    %13 = vector.broadcast %cst : f32 to vector<1x128xf32>
    %14 = arith.maximumf %12, %13 : vector<1x128xf32>
    %15 = vector.extract_strided_slice %0 {offsets = [0, 0], sizes = [1, 128], strides = [1, 1]} : vector<2x128xf32> to vector<1x128xf32>
    %c1 = arith.constant 1 : index
    %16 = memref.load %arg1[%c1] : memref<17xf32, #tpu.memory_space<smem>>
    %17 = vector.broadcast %16 : f32 to vector<1x128xf32>
    %18 = arith.mulf %15, %17 : vector<1x128xf32>
    %19 = vector.extract_strided_slice %0 {offsets = [1, 0], sizes = [1, 128], strides = [1, 1]} : vector<2x128xf32> to vector<1x128xf32>
    %c5 = arith.constant 5 : index
    %20 = memref.load %arg1[%c5] : memref<17xf32, #tpu.memory_space<smem>>
    %21 = vector.broadcast %20 : f32 to vector<1x128xf32>
    %22 = arith.mulf %19, %21 : vector<1x128xf32>
    %23 = arith.addf %18, %22 : vector<1x128xf32>
    %c9 = arith.constant 9 : index
    %24 = memref.load %arg1[%c9] : memref<17xf32, #tpu.memory_space<smem>>
    %25 = vector.broadcast %24 : f32 to vector<1x128xf32>
    %26 = arith.addf %23, %25 : vector<1x128xf32>
    %cst_2 = arith.constant 0.000000e+00 : f32
    %27 = vector.broadcast %cst_2 : f32 to vector<1x128xf32>
    %28 = arith.maximumf %26, %27 : vector<1x128xf32>
    %29 = vector.extract_strided_slice %0 {offsets = [0, 0], sizes = [1, 128], strides = [1, 1]} : vector<2x128xf32> to vector<1x128xf32>
    %c2 = arith.constant 2 : index
    %30 = memref.load %arg1[%c2] : memref<17xf32, #tpu.memory_space<smem>>
    %31 = vector.broadcast %30 : f32 to vector<1x128xf32>
    %32 = arith.mulf %29, %31 : vector<1x128xf32>
    %33 = vector.extract_strided_slice %0 {offsets = [1, 0], sizes = [1, 128], strides = [1, 1]} : vector<2x128xf32> to vector<1x128xf32>
    %c6 = arith.constant 6 : index
    %34 = memref.load %arg1[%c6] : memref<17xf32, #tpu.memory_space<smem>>
    %35 = vector.broadcast %34 : f32 to vector<1x128xf32>
    %36 = arith.mulf %33, %35 : vector<1x128xf32>
    %37 = arith.addf %32, %36 : vector<1x128xf32>
    %c10 = arith.constant 10 : index
    %38 = memref.load %arg1[%c10] : memref<17xf32, #tpu.memory_space<smem>>
    %39 = vector.broadcast %38 : f32 to vector<1x128xf32>
    %40 = arith.addf %37, %39 : vector<1x128xf32>
    %cst_3 = arith.constant 0.000000e+00 : f32
    %41 = vector.broadcast %cst_3 : f32 to vector<1x128xf32>
    %42 = arith.maximumf %40, %41 : vector<1x128xf32>
    %43 = vector.extract_strided_slice %0 {offsets = [0, 0], sizes = [1, 128], strides = [1, 1]} : vector<2x128xf32> to vector<1x128xf32>
    %c3 = arith.constant 3 : index
    %44 = memref.load %arg1[%c3] : memref<17xf32, #tpu.memory_space<smem>>
    %45 = vector.broadcast %44 : f32 to vector<1x128xf32>
    %46 = arith.mulf %43, %45 : vector<1x128xf32>
    %47 = vector.extract_strided_slice %0 {offsets = [1, 0], sizes = [1, 128], strides = [1, 1]} : vector<2x128xf32> to vector<1x128xf32>
    %c7 = arith.constant 7 : index
    %48 = memref.load %arg1[%c7] : memref<17xf32, #tpu.memory_space<smem>>
    %49 = vector.broadcast %48 : f32 to vector<1x128xf32>
    %50 = arith.mulf %47, %49 : vector<1x128xf32>
    %51 = arith.addf %46, %50 : vector<1x128xf32>
    %c11 = arith.constant 11 : index
    %52 = memref.load %arg1[%c11] : memref<17xf32, #tpu.memory_space<smem>>
    %53 = vector.broadcast %52 : f32 to vector<1x128xf32>
    %54 = arith.addf %51, %53 : vector<1x128xf32>
    %cst_4 = arith.constant 0.000000e+00 : f32
    %55 = vector.broadcast %cst_4 : f32 to vector<1x128xf32>
    %56 = arith.maximumf %54, %55 : vector<1x128xf32>
    %c12 = arith.constant 12 : index
    %57 = memref.load %arg1[%c12] : memref<17xf32, #tpu.memory_space<smem>>
    %58 = vector.broadcast %57 : f32 to vector<1x128xf32>
    %59 = arith.mulf %14, %58 : vector<1x128xf32>
    %c13 = arith.constant 13 : index
    %60 = memref.load %arg1[%c13] : memref<17xf32, #tpu.memory_space<smem>>
    %61 = vector.broadcast %60 : f32 to vector<1x128xf32>
    %62 = arith.mulf %28, %61 : vector<1x128xf32>
    %63 = arith.addf %59, %62 : vector<1x128xf32>
    %c14 = arith.constant 14 : index
    %64 = memref.load %arg1[%c14] : memref<17xf32, #tpu.memory_space<smem>>
    %65 = vector.broadcast %64 : f32 to vector<1x128xf32>
    %66 = arith.mulf %42, %65 : vector<1x128xf32>
    %67 = arith.addf %63, %66 : vector<1x128xf32>
    %c15 = arith.constant 15 : index
    %68 = memref.load %arg1[%c15] : memref<17xf32, #tpu.memory_space<smem>>
    %69 = vector.broadcast %68 : f32 to vector<1x128xf32>
    %70 = arith.mulf %56, %69 : vector<1x128xf32>
    %71 = arith.addf %67, %70 : vector<1x128xf32>
    %c16 = arith.constant 16 : index
    %72 = memref.load %arg1[%c16] : memref<17xf32, #tpu.memory_space<smem>>
    %73 = vector.broadcast %72 : f32 to vector<1x128xf32>
    %74 = arith.addf %71, %73 : vector<1x128xf32>
    %75 = math.tanh %74 : vector<1x128xf32>
    %c0_5 = arith.constant 0 : index
    %c0_6 = arith.constant 0 : index
    %76 = vector.load %arg3[%c0_5, %c0_6] : memref<1x128xf32, #tpu.memory_space<vmem>>, vector<1x128xf32>
    tpu.vector_store %arg3[%c0_5, %c0_6], %75 {strides = array<i32>} : memref<1x128xf32, #tpu.memory_space<vmem>>, vector<1x128xf32>,
    return
  }
  func.func @transform_0(%arg0: i32) -> i32 {
    %c0_i32 = arith.constant 0 : i32
    %c0_i32_0 = arith.constant 0 : i32
    return %c0_i32 : i32
  }
  func.func @transform_1(%arg0: i32) -> (i32, i32) {
    %c0_i32 = arith.constant 0 : i32
    %c0_i32_0 = arith.constant 0 : i32
    return %c0_i32, %arg0 : i32, i32
  }
  func.func @transform_2(%arg0: i32) -> (i32, i32) {
    %c0_i32 = arith.constant 0 : i32
    %c0_i32_0 = arith.constant 0 : i32
    return %c0_i32, %arg0 : i32, i32
  }
}

</mosaic_0001>

<bundles_post_ra>
// kernel: tpu_custom_call.1
= control target key start
LH: loop header
LB: loop body
LE: loop exit
PB: predicated region body
PF: predicated region fallthrough
CT: control target
= control target key end

     0   :  { %7 = vsyncpa [#allocation5], 0  ;;  %s239_s0 = inlined_call_operand.hbm [shape: f32[17], index: 0, kind: input, shape index: {}]   ;;  %s240_s1 = inlined_call_operand.hbm [shape: f32[2,128], index: 1, kind: input, shape index: {}]   ;;  %s241_s2 = inlined_call_operand.hbm [shape: f32[1,128], index: 2, kind: output, shape index: {}]  }
   0x1   :  { %8 = vsyncpa [#allocation3], 0 }
   0x2   :  { %9 = vsyncpa [#allocation4], 0  ;;  %s203_s9 = smov [#allocation2]   ;;  %s204_s12 = smov [#allocation6]  }
   0x3   :  { %17 = dma.hbm_to_smem %s239_s0, 16, %s203_s9, [#allocation5]  }
   0x4   :  { %s24_s13 = sshll.u32 %s204_s12, 4  ;;  %s25_s13 = int_to_ptr.vmem [resolvable:$true] %s24_s13 }
   0x5   :  { %s165_s14 = scalar_lea.vmem %s25_s13, 32  ;;  %p170_p1 = scmp.lt.s32.totalorder %s25_s13, %s25_s13 }
   0x6   :  { %p166_p0 = scmp.ne.s32.totalorder %s25_s13, %s165_s14  ;;  %p171_p2 = scmp.lt.s32.totalorder %s165_s14, %s165_s14 }
   0x8   :  { %p172_p3 = por %p171_p2, %p170_p1 }
   0xa   :  { %p173_p4 = pnand %p172_p3, %p166_p0 }
   0xc   :  { %176 = shalt.err (!%p173_p4)
}
   0xd   :  { %27 = dma.hbm_to_vmem [thread:$0]  %s240_s1, 32, %s25_s13, [#allocation3]  }
   0xe   :  { %197 = dma.done.wait [#allocation5], 16  }
   0xf   :  { %198 = vsyncadd [#allocation5], 4294967280 }
  0x10   :  { %199 = dma.done.wait [#allocation3], 32  }
  0x11   :  { %200 = vsyncadd [#allocation3], 4294967264 }
  0x12   :  { %34 = sfence }
  0x13   :  { %s36_s0 = sld [smem:[#allocation2]]  ;;  %v35_v0 = vld [vmem:[#allocation6] sm:$0x3]  ;;  %s205_s4 = smov [#allocation7]  }
  0x14   :  { %s128_s17 = sld [smem:[#allocation2 + $0x4]]  ;;  %s118_s5 = sshll.u32 %s205_s4, 4  ;;  %s119_s5 = int_to_ptr.vmem [resolvable:$true] %s118_s5 }
  0x15   :  { %s129_s18 = sld [smem:[#allocation2 + $0x8]]  ;;  %s177_s6 = scalar_lea.vmem %s119_s5, 16 }
  0x16   :  { %s130_s19 = sld [smem:[#allocation2 + $0x1]]  ;;  %p178_p5 = scmp.ne.s32.totalorder %s119_s5, %s177_s6 }
  0x17   :  { %s131_s20 = sld [smem:[#allocation2 + $0x5]]  ;;  %s181_s7 = scalar_lea.vmem %s119_s5, 32 }
  0x18   :  { %s227_s21 = sld [smem:[#allocation2 + $0x9]]  ;;  %p182_p6 = scmp.lt.s32.totalorder %s119_s5, %s119_s5 }
  0x19   :  { %v37_v1 = vstv %s36_s0  ;;  %s133_s22 = sld [smem:[#allocation2 + $0x2]]  ;;  %p183_p7 = scmp.lt.s32.totalorder %s181_s7, %s177_s6 }
  0x1a   :  { %v40_v2 = vstv %s128_s17  ;;  %s134_s23 = sld [smem:[#allocation2 + $0x6]]  ;;  %v38_v3 = vmul.f32 %v37_v1, %v35_v0 }
  0x1b   :  { %v41_v4 = vmul.f32 %v40_v2, %v35_v0  ;;  %s229_s1 = sld [smem:[#allocation2 + $0xa]]  ;;  %v47_v8 = vstv %s129_s18  ;;  %p184_p8 = por %p183_p7, %p182_p6 }
  0x1c   :  { %v51_v5 = vstv %s130_s19  ;;  %s136_s24 = sld [smem:[#allocation2 + $0x3]] }
  0x1d   :  { %v43_v6 = vrot.slane %v41_v4, 1  ;;  %v54_v7 = vstv %s131_s20  ;;  %s137_s25 = sld [smem:[#allocation2 + $0x7]]  ;;  %v52_v9 = vmul.f32 %v51_v5, %v35_v0  ;;  %p185_p9 = pnand %p184_p8, %p178_p5 }
  0x1e   :  { %v55_v10 = vmul.f32 %v54_v7, %v35_v0  ;;  %s231_s26 = sld [smem:[#allocation2 + $0xb]]  ;;  %v61_v16 = vstv %s227_s21 }
  0x1f   :  { %v45_v11 = vadd.f32 %v43_v6, %v38_v3  ;;  %v65_v12 = vstv %s133_s22  ;;  %s139_s27 = sld [smem:[#allocation2 + $0xc]] }
  0x20   :  { %v57_v13 = vrot.slane %v55_v10, 1  ;;  %v68_v14 = vstv %s134_s23  ;;  %s140_s28 = sld [smem:[#allocation2 + $0xd]]  ;;  %v66_v17 = vmul.f32 %v65_v12, %v35_v0 }
  0x21   :  { %v48_v15 = vadd.f32 %v47_v8, %v45_v11  ;;  %v69_v18 = vmul.f32 %v68_v14, %v35_v0  ;;  %s141_s29 = sld [smem:[#allocation2 + $0xe]]  ;;  %v75_v25 = vstv %s229_s1 }
  0x22   :  { %v59_v19 = vadd.f32 %v57_v13, %v52_v9  ;;  %v79_v20 = vstv %s136_s24  ;;  %s142_s30 = sld [smem:[#allocation2 + $0xf]] }
  0x23   :  { %v49_v21 = vmax.f32 %v48_v15, 0.0  ;;  %v71_v22 = vrot.slane %v69_v18, 1  ;;  %v82_v23 = vstv %s137_s25  ;;  %v80_v26 = vmul.f32 %v79_v20, %v35_v0  ;;  %s143_s3 = sld [smem:[#allocation2 + $0x10]] }
  0x24   :  { %v62_v24 = vadd.f32 %v61_v16, %v59_v19  ;;  %v83_v27 = vmul.f32 %v82_v23, %v35_v0  ;;  %v89_v35 = vstv %s231_s26 }
  0x25   :  { %v73_v28 = vadd.f32 %v71_v22, %v66_v17  ;;  %v93_v29 = vstv %s139_s27 }
  0x26   :  { %v63_v30 = vmax.f32 %v62_v24, 0.0  ;;  %v85_v31 = vrot.slane %v83_v27, 1  ;;  %v94_v32 = vmul.f32 %v93_v29, %v49_v21  ;;  %v96_v33 = vstv %s140_s28 }
  0x27   :  { %v76_v34 = vadd.f32 %v75_v25, %v73_v28  ;;  %v100_v38 = vstv %s141_s29 }
  0x28   :  { %v87_v36 = vadd.f32 %v85_v31, %v80_v26  ;;  %v97_v37 = vmul.f32 %v96_v33, %v63_v30  ;;  %v104_v43 = vstv %s142_s30 }
  0x29   :  { %v77_v39 = vmax.f32 %v76_v34, 0.0  ;;  %v108_v47 = vstv %s143_s3 }
  0x2a   :  { %v90_v40 = vadd.f32 %v89_v35, %v87_v36  ;;  %v98_v41 = vadd.f32 %v97_v37, %v94_v32 }
  0x2b   :  { %v101_v42 = vmul.f32 %v100_v38, %v77_v39 }
  0x2c   :  { %v91_v44 = vmax.f32 %v90_v40, 0.0 }
  0x2d   :  { %v102_v45 = vadd.f32 %v101_v42, %v98_v41 }
  0x2e   :  { %v105_v46 = vmul.f32 %v104_v43, %v91_v44 }
  0x30   :  { %v106_v48 = vadd.f32 %v105_v46, %v102_v45 }
  0x32   :  { %v109_v49 = vadd.f32 %v108_v47, %v106_v48 }
  0x34   :  { %147 = vtanh.f32 %v109_v49 }
  0x41   :  { %v148_v50 = vpop.eup %147 }
  0x42   :  { %111 = vst [vmem:[#allocation7] sm:$0x1] %v148_v50 }
  0x43   :  { %188 = shalt.err (!%p185_p9)
}
  0x44   :  { %121 = dma.vmem_to_hbm [thread:$0]  %s119_s5, 16, %s241_s2, [#allocation4]  }
  0x45   :  { %201 = dma.done.wait [#allocation4], 16  }
  0x46   :  { %202 = vsyncadd [#allocation4], 4294967280 }
  0x47   :  { %125 = vsyncpa [#allocation3], 1 }
  0x48   :  { %126 = vsyncpa [#allocation4], 1 }
  0x49   :  { %127 = vsyncpa [#allocation5], 1 }

</bundles_post_ra>
